<compile_context>
chip_gen: v6e
topology: v6e:2x2x1
jax: 0.10.0
libtpu: 0.0.40
codegen_flags: <defaults>
</compile_context>

<pallas_src>
import jax
import jax.numpy as jnp
from jax import lax
from jax.experimental import pallas as pl
from jax.experimental.pallas import tpu as pltpu


_DN_LAST = (((1,), (1,)), ((), ()))   # contract last axis of both operands


def self_attn_flow_kernel(x_ref, bias_col_ref, bias_row_ref,
                          w_sim_ref, w_merge_ref, b_merge_ref, out_ref):
    # x:        (T, D) current batch element (f32)
    # bias_col: (T, 1) -1e10 where context position i is padded, else 0
    # bias_row: (1, T) -1e10 where query   position j is padded, else 0
    x = x_ref[0].astype(jnp.float32)
    bias_col = bias_col_ref[0]
    bias_row = bias_row_ref[0]

    w_sim = w_sim_ref[...]            # (3, D) rows: [w_context, w_query, w_prod]
    w1 = w_sim[0:1, :]                # context term
    w2 = w_sim[1:2, :]                # query term
    w3 = w_sim[2:3, :]                # product term

    x_bf = x.astype(jnp.bfloat16)

    # similarity[i, j] = w1.c_i + w2.c_j + w3.(c_i * c_j)
    # Fold the column term into the LHS of the product matmul:
    #   (c_i*w3 + w2) . c_j = w3.(c_i*c_j) + w2.c_j
    lhs = (x * w3 + w2).astype(jnp.bfloat16)                      # (T, D)
    sim = lax.dot_general(lhs, x_bf, dimension_numbers=_DN_LAST,
                          preferred_element_type=jnp.float32)     # (T, T)
    a = jnp.sum(x * w1, axis=-1, keepdims=True)                   # (T, 1)
    sim = sim + a + bias_col + bias_row                           # additive mask

    # softmax along last axis (f32)
    sim_max = jnp.max(sim, axis=-1, keepdims=True)
    e = jnp.exp(sim - sim_max)
    denom = jnp.sum(e, axis=-1, keepdims=True)
    p = e * pl.reciprocal(denom, approx=True)

    # c2q attention: (T, T) @ (T, D) -> (T, D); bf16 MXU operands, f32 accum
    c2q = jnp.dot(p.astype(jnp.bfloat16), x_bf,
                  preferred_element_type=jnp.float32)             # (T, D)

    # merge linear over concat(x, c2q, x*c2q) == three accumulating dots
    merged = jnp.dot(x_bf, w_merge_ref[0], preferred_element_type=jnp.float32)
    merged += jnp.dot(c2q.astype(jnp.bfloat16), w_merge_ref[1],
                      preferred_element_type=jnp.float32)
    merged += jnp.dot((x * c2q).astype(jnp.bfloat16), w_merge_ref[2],
                      preferred_element_type=jnp.float32)
    merged += b_merge_ref[...]
    out = jnp.maximum(merged, 0.0)

    # zero out padded context positions
    out = jnp.where(bias_col < 0.0, 0.0, out)
    out_ref[0] = out.astype(out_ref.dtype)


def self_attention_flow(inp, inp_mask, w_sim, w_merge, b_merge):
    """inp: (B, T, D) f32; inp_mask: (B, T) bool (True = pad).
    w_sim: (1, 3D) similarity weight (no bias); w_merge: (D, 3D); b_merge: (D,)."""
    B, T, D = inp.shape
    neg = jnp.float32(-1e10)

    mask_bias = inp_mask.astype(jnp.float32) * neg        # (B, T), -1e10 at pads
    bias_col = mask_bias.reshape(B, T, 1)
    bias_row = mask_bias.reshape(B, 1, T)

    w_sim3 = w_sim.reshape(3, D).astype(jnp.float32)      # [context, query, product]
    # split merge weight into three (D_in=D, D_out=D) blocks: wm[k] = W[:, kD:(k+1)D].T
    wm = jnp.transpose(w_merge.reshape(D, 3, D), (1, 2, 0)).astype(jnp.bfloat16)
    b_merge2 = b_merge.reshape(1, D).astype(jnp.float32)

    return pl.pallas_call(
        self_attn_flow_kernel,
        out_shape=jax.ShapeDtypeStruct((B, T, D), inp.dtype),
        grid=(B,),
        in_specs=[
            pl.BlockSpec((1, T, D), lambda b: (b, 0, 0)),     # inp, per-batch tile
            pl.BlockSpec((1, T, 1), lambda b: (b, 0, 0)),     # column mask bias
            pl.BlockSpec((1, 1, T), lambda b: (b, 0, 0)),     # row mask bias
            pl.BlockSpec((3, D), lambda b: (0, 0)),           # similarity weights
            pl.BlockSpec((3, D, D), lambda b: (0, 0, 0)),     # merge weights (split, bf16)
            pl.BlockSpec((1, D), lambda b: (0, 0)),           # merge bias
        ],
        out_specs=pl.BlockSpec((1, T, D), lambda b: (b, 0, 0)),
        compiler_params=pltpu.CompilerParams(dimension_semantics=("parallel",)),
    )(inp, bias_col, bias_row, w_sim3, wm, b_merge2)


if __name__ == "__main__":
    key = jax.random.PRNGKey(0)
    model_dim = 16
    B, T = 2, 8
    D = 2 * model_dim          # inp feature dim = model_dim * 2

    k1, k2, k3, k4 = jax.random.split(key, 4)

    inp = jax.random.normal(k1, (B, T, D), dtype=jnp.float32)
    # last 2 positions of each sequence are padding
    inp_mask = jnp.broadcast_to(jnp.arange(T)[None, :] >= (T - 2), (B, T))

    # linear_similarity_matrix: Linear(6*model_dim -> 1, bias=False), xavier_normal init
    fan_in, fan_out = 3 * D, 1
    std_sim = (2.0 / (fan_in + fan_out)) ** 0.5
    w_sim = std_sim * jax.random.normal(k2, (1, 3 * D), dtype=jnp.float32)

    # merge_linear: Linear(6*model_dim -> 2*model_dim), PyTorch-default uniform init
    bound = 1.0 / (3 * D) ** 0.5
    w_merge = jax.random.uniform(k3, (D, 3 * D), minval=-bound, maxval=bound,
                                 dtype=jnp.float32)
    b_merge = jax.random.uniform(k4, (D,), minval=-bound, maxval=bound,
                                 dtype=jnp.float32)

    out = self_attention_flow(inp, inp_mask, w_sim, w_merge, b_merge)
    jax.block_until_ready(out)
    assert out.shape == (B, T, D)
    print("KERNEL_OK")
</pallas_src>

<mosaic_0001>
module attributes {stable_mosaic.version = 11 : i64} {
  func.func @self_attn_flow_kernel(%arg0: i32, %arg1: memref<1x8x32xf32, #tpu.memory_space<vmem>>, %arg2: memref<1x8x1xf32, #tpu.memory_space<vmem>>, %arg3: memref<1x1x8xf32, #tpu.memory_space<vmem>>, %arg4: memref<3x32xf32, #tpu.memory_space<vmem>>, %arg5: memref<3x32x32xbf16, #tpu.memory_space<vmem>>, %arg6: memref<1x32xf32, #tpu.memory_space<vmem>>, %arg7: memref<1x8x32xf32, #tpu.memory_space<vmem>>) attributes {dimension_semantics = [#tpu.dimension_semantics<parallel>], iteration_bounds = array<i64: 2>, scalar_prefetch = 0 : i64, scratch_operands = 0 : i64, tpu.core_type = #tpu.core_type<tc>, window_params = [{transform_indices = @transform_0, window_bounds = array<i64: 1, 8, 32>}, {transform_indices = @transform_1, window_bounds = array<i64: 1, 8, 1>}, {transform_indices = @transform_2, window_bounds = array<i64: 1, 1, 8>}, {pipeline_mode = #tpu.pipeline_mode<synchronous>, transform_indices = @transform_3, window_bounds = array<i64: 3, 32>}, {pipeline_mode = #tpu.pipeline_mode<synchronous>, transform_indices = @transform_4, window_bounds = array<i64: 3, 32, 32>}, {pipeline_mode = #tpu.pipeline_mode<synchronous>, transform_indices = @transform_5, window_bounds = array<i64: 1, 32>}, {transform_indices = @transform_6, window_bounds = array<i64: 1, 8, 32>}]} {
    %c0 = arith.constant 0 : index
    %c0_0 = arith.constant 0 : index
    %c0_1 = arith.constant 0 : index
    %0 = vector.load %arg1[%c0, %c0_0, %c0_1] : memref<1x8x32xf32, #tpu.memory_space<vmem>>, vector<1x8x32xf32>
    %1 = vector.shape_cast %0 : vector<1x8x32xf32> to vector<8x32xf32>
    %c0_2 = arith.constant 0 : index
    %c0_3 = arith.constant 0 : index
    %c0_4 = arith.constant 0 : index
    %2 = vector.load %arg2[%c0_2, %c0_3, %c0_4] : memref<1x8x1xf32, #tpu.memory_space<vmem>>, vector<1x8x1xf32>
    %3 = vector.shape_cast %2 : vector<1x8x1xf32> to vector<8x1xf32>
    %c0_5 = arith.constant 0 : index
    %c0_6 = arith.constant 0 : index
    %c0_7 = arith.constant 0 : index
    %4 = vector.load %arg3[%c0_5, %c0_6, %c0_7] : memref<1x1x8xf32, #tpu.memory_space<vmem>>, vector<1x1x8xf32>
    %5 = vector.shape_cast %4 : vector<1x1x8xf32> to vector<1x8xf32>
    %c0_8 = arith.constant 0 : index
    %c0_9 = arith.constant 0 : index
    %6 = vector.load %arg4[%c0_8, %c0_9] : memref<3x32xf32, #tpu.memory_space<vmem>>, vector<3x32xf32>
    %7 = vector.extract_strided_slice %6 {offsets = [0, 0], sizes = [1, 32], strides = [1, 1]} : vector<3x32xf32> to vector<1x32xf32>
    %8 = vector.extract_strided_slice %6 {offsets = [1, 0], sizes = [1, 32], strides = [1, 1]} : vector<3x32xf32> to vector<1x32xf32>
    %9 = vector.extract_strided_slice %6 {offsets = [2, 0], sizes = [1, 32], strides = [1, 1]} : vector<3x32xf32> to vector<1x32xf32>
    %10 = arith.truncf %1 : vector<8x32xf32> to vector<8x32xbf16>
    %11 = vector.broadcast %9 : vector<1x32xf32> to vector<8x32xf32>
    %12 = arith.mulf %1, %11 : vector<8x32xf32>
    %13 = vector.broadcast %8 : vector<1x32xf32> to vector<8x32xf32>
    %14 = arith.addf %12, %13 : vector<8x32xf32>
    %15 = arith.truncf %14 : vector<8x32xf32> to vector<8x32xbf16>
    %cst = arith.constant dense<0.000000e+00> : vector<8x8xf32>
    %16 = tpu.matmul %15, %10, %cst {dimension_numbers = #tpu.dot_dimension_numbers<[1], [1], [0], [0], [0, 0, 1, 0], [], []>} : vector<8x32xbf16>, vector<8x32xbf16>, vector<8x8xf32> -> vector<8x8xf32>
    %17 = vector.broadcast %7 : vector<1x32xf32> to vector<8x32xf32>
    %18 = arith.mulf %1, %17 : vector<8x32xf32>
    %cst_10 = arith.constant dense<0.000000e+00> : vector<8xf32>
    %19 = vector.multi_reduction <add>, %18, %cst_10 [1] : vector<8x32xf32> to vector<8xf32>
    %20 = vector.shape_cast %19 : vector<8xf32> to vector<8x1xf32>
    %21 = vector.broadcast %20 : vector<8x1xf32> to vector<8x8xf32>
    %22 = arith.addf %16, %21 : vector<8x8xf32>
    %23 = vector.broadcast %3 : vector<8x1xf32> to vector<8x8xf32>
    %24 = arith.addf %22, %23 : vector<8x8xf32>
    %25 = vector.broadcast %5 : vector<1x8xf32> to vector<8x8xf32>
    %26 = arith.addf %24, %25 : vector<8x8xf32>
    %cst_11 = arith.constant dense<0xFF800000> : vector<8xf32>
    %27 = vector.multi_reduction <maximumf>, %26, %cst_11 [1] : vector<8x8xf32> to vector<8xf32>
    %28 = vector.shape_cast %27 : vector<8xf32> to vector<8x1xf32>
    %29 = vector.broadcast %28 : vector<8x1xf32> to vector<8x8xf32>
    %30 = arith.subf %26, %29 : vector<8x8xf32>
    %31 = math.exp %30 : vector<8x8xf32>
    %cst_12 = arith.constant dense<0.000000e+00> : vector<8xf32>
    %32 = vector.multi_reduction <add>, %31, %cst_12 [1] : vector<8x8xf32> to vector<8xf32>
    %33 = vector.shape_cast %32 : vector<8xf32> to vector<8x1xf32>
    %34 = tpu.reciprocal %33 {approx = true} : vector<8x1xf32> -> vector<8x1xf32>
    %35 = vector.broadcast %34 : vector<8x1xf32> to vector<8x8xf32>
    %36 = arith.mulf %31, %35 : vector<8x8xf32>
    %37 = arith.truncf %36 : vector<8x8xf32> to vector<8x8xbf16>
    %cst_13 = arith.constant dense<0.000000e+00> : vector<8x32xf32>
    %38 = tpu.matmul %37, %10, %cst_13 {dimension_numbers = #tpu.dot_dimension_numbers<[1], [0], [0], [1], [0, 0, 1, 1], [], []>} : vector<8x8xbf16>, vector<8x32xbf16>, vector<8x32xf32> -> vector<8x32xf32>
    %c0_14 = arith.constant 0 : index
    %c0_15 = arith.constant 0 : index
    %c0_16 = arith.constant 0 : index
    %39 = vector.load %arg5[%c0_14, %c0_15, %c0_16] : memref<3x32x32xbf16, #tpu.memory_space<vmem>>, vector<1x32x32xbf16>
    %40 = vector.shape_cast %39 : vector<1x32x32xbf16> to vector<32x32xbf16>
    %cst_17 = arith.constant dense<0.000000e+00> : vector<8x32xf32>
    %41 = tpu.matmul %10, %40, %cst_17 {dimension_numbers = #tpu.dot_dimension_numbers<[1], [0], [0], [1], [0, 0, 1, 1], [], []>} : vector<8x32xbf16>, vector<32x32xbf16>, vector<8x32xf32> -> vector<8x32xf32>
    %42 = arith.truncf %38 : vector<8x32xf32> to vector<8x32xbf16>
    %c1 = arith.constant 1 : index
    %c0_18 = arith.constant 0 : index
    %c0_19 = arith.constant 0 : index
    %43 = vector.load %arg5[%c1, %c0_18, %c0_19] : memref<3x32x32xbf16, #tpu.memory_space<vmem>>, vector<1x32x32xbf16>
    %44 = vector.shape_cast %43 : vector<1x32x32xbf16> to vector<32x32xbf16>
    %cst_20 = arith.constant dense<0.000000e+00> : vector<8x32xf32>
    %45 = tpu.matmul %42, %44, %cst_20 {dimension_numbers = #tpu.dot_dimension_numbers<[1], [0], [0], [1], [0, 0, 1, 1], [], []>} : vector<8x32xbf16>, vector<32x32xbf16>, vector<8x32xf32> -> vector<8x32xf32>
    %46 = arith.addf %41, %45 : vector<8x32xf32>
    %47 = arith.mulf %1, %38 : vector<8x32xf32>
    %48 = arith.truncf %47 : vector<8x32xf32> to vector<8x32xbf16>
    %c2 = arith.constant 2 : index
    %c0_21 = arith.constant 0 : index
    %c0_22 = arith.constant 0 : index
    %49 = vector.load %arg5[%c2, %c0_21, %c0_22] : memref<3x32x32xbf16, #tpu.memory_space<vmem>>, vector<1x32x32xbf16>
    %50 = vector.shape_cast %49 : vector<1x32x32xbf16> to vector<32x32xbf16>
    %cst_23 = arith.constant dense<0.000000e+00> : vector<8x32xf32>
    %51 = tpu.matmul %48, %50, %cst_23 {dimension_numbers = #tpu.dot_dimension_numbers<[1], [0], [0], [1], [0, 0, 1, 1], [], []>} : vector<8x32xbf16>, vector<32x32xbf16>, vector<8x32xf32> -> vector<8x32xf32>
    %52 = arith.addf %46, %51 : vector<8x32xf32>
    %c0_24 = arith.constant 0 : index
    %c0_25 = arith.constant 0 : index
    %53 = vector.load %arg6[%c0_24, %c0_25] : memref<1x32xf32, #tpu.memory_space<vmem>>, vector<1x32xf32>
    %54 = vector.broadcast %53 : vector<1x32xf32> to vector<8x32xf32>
    %55 = arith.addf %52, %54 : vector<8x32xf32>
    %cst_26 = arith.constant 0.000000e+00 : f32
    %56 = vector.broadcast %cst_26 : f32 to vector<8x32xf32>
    %57 = arith.maximumf %55, %56 : vector<8x32xf32>
    %cst_27 = arith.constant 0.000000e+00 : f32
    %58 = vector.broadcast %cst_27 : f32 to vector<8x1xf32>
    %59 = arith.cmpf olt, %3, %58 : vector<8x1xf32>
    %cst_28 = arith.constant 0.000000e+00 : f32
    %60 = vector.shape_cast %59 : vector<8x1xi1> to vector<8x1xi1>
    %61 = vector.broadcast %60 : vector<8x1xi1> to vector<8x32xi1>
    %62 = vector.broadcast %cst_28 : f32 to vector<8x32xf32>
    %63 = arith.select %61, %62, %57 : vector<8x32xi1>, vector<8x32xf32>
    %c0_29 = arith.constant 0 : index
    %c0_30 = arith.constant 0 : index
    %c0_31 = arith.constant 0 : index
    %64 = vector.load %arg7[%c0_29, %c0_30, %c0_31] : memref<1x8x32xf32, #tpu.memory_space<vmem>>, vector<1x8x32xf32>
    %65 = vector.shape_cast %64 : vector<1x8x32xf32> to vector<8x32xf32>
    %66 = vector.shape_cast %63 : vector<8x32xf32> to vector<1x8x32xf32>
    tpu.vector_store %arg7[%c0_29, %c0_30, %c0_31], %66 {strides = array<i32>} : memref<1x8x32xf32, #tpu.memory_space<vmem>>, vector<1x8x32xf32>,
    return
  }
  func.func @transform_0(%arg0: i32) -> (i32, i32, i32) {
    %c0_i32 = arith.constant 0 : i32
    %c0_i32_0 = arith.constant 0 : i32
    %c0_i32_1 = arith.constant 0 : i32
    return %arg0, %c0_i32, %c0_i32_0 : i32, i32, i32
  }
  func.func @transform_1(%arg0: i32) -> (i32, i32, i32) {
    %c0_i32 = arith.constant 0 : i32
    %c0_i32_0 = arith.constant 0 : i32
    %c0_i32_1 = arith.constant 0 : i32
    return %arg0, %c0_i32, %c0_i32_0 : i32, i32, i32
  }
  func.func @transform_2(%arg0: i32) -> (i32, i32, i32) {
    %c0_i32 = arith.constant 0 : i32
    %c0_i32_0 = arith.constant 0 : i32
    %c0_i32_1 = arith.constant 0 : i32
    return %arg0, %c0_i32, %c0_i32_0 : i32, i32, i32
  }
  func.func @transform_3(%arg0: i32) -> (i32, i32) {
    %c0_i32 = arith.constant 0 : i32
    %c0_i32_0 = arith.constant 0 : i32
    %c0_i32_1 = arith.constant 0 : i32
    return %c0_i32, %c0_i32_0 : i32, i32
  }
  func.func @transform_4(%arg0: i32) -> (i32, i32, i32) {
    %c0_i32 = arith.constant 0 : i32
    %c0_i32_0 = arith.constant 0 : i32
    %c0_i32_1 = arith.constant 0 : i32
    %c0_i32_2 = arith.constant 0 : i32
    return %c0_i32, %c0_i32_0, %c0_i32_1 : i32, i32, i32
  }
  func.func @transform_5(%arg0: i32) -> (i32, i32) {
    %c0_i32 = arith.constant 0 : i32
    %c0_i32_0 = arith.constant 0 : i32
    %c0_i32_1 = arith.constant 0 : i32
    return %c0_i32, %c0_i32_0 : i32, i32
  }
  func.func @transform_6(%arg0: i32) -> (i32, i32, i32) {
    %c0_i32 = arith.constant 0 : i32
    %c0_i32_0 = arith.constant 0 : i32
    %c0_i32_1 = arith.constant 0 : i32
    return %arg0, %c0_i32, %c0_i32_0 : i32, i32, i32
  }
}

</mosaic_0001>

<bundles_post_ra>
// kernel: tpu_custom_call.1
= control target key start
LH: loop header
LB: loop body
LE: loop exit
PB: predicated region body
PF: predicated region fallthrough
CT: control target
= control target key end

     0   :  { %s1304_s0 = inlined_call_operand.vmem [shape: f32[2,8,32], index: 0, kind: input, shape index: {}]   ;;  %s1305_s1 = inlined_call_operand.vmem [shape: f32[2,8,1], index: 1, kind: input, shape index: {}]   ;;  %s1306_s2 = inlined_call_operand.hbm [shape: f32[2,1,8], index: 2, kind: input, shape index: {}]   ;;  %s1307_s3 = inlined_call_operand.vmem [shape: f32[3,32], index: 3, kind: input, shape index: {}]   ;;  %s1308_s4 = inlined_call_operand.hbm [shape: bf16[3,32,32], index: 4, kind: input, shape index: {}]   ;;  %s1309_s5 = inlined_call_operand.vmem [shape: f32[1,32], index: 5, kind: input, shape index: {}]   ;;  %s1310_s6 = inlined_call_operand.hbm [shape: f32[2,8,32], index: 6, kind: output, shape index: {}]  }
   0x1   :  { %1315 = sst [smem:[#allocation11_spill]] %s1308_s4 }
   0x2   :  { %11 = vsyncpa [#allocation3], 0 }
   0x3   :  { %13 = vsyncpa [#allocation3 + $0x1], 0 }
   0x4   :  { %14 = vsyncpa [#allocation6], 0 }
   0x5   :  { %15 = vsyncpa [#allocation4], 0 }
   0x6   :  { %17 = vsyncpa [#allocation4 + $0x1], 0  ;;  %s1086_s21 = smov 0   ;;  %s1088_s22 = smov 0  }
   0x7   :  { %s1090_s23 = smov 0   ;;  %s1092_s24 = smov 0  }
   0x8 LB: > { %s1107_s25 = sadd.s32 4294967295, %s1041_s24   ;;  %s769_s26 = sadd.s32 4294967294, %s1041_s24   ;;  %s1041_s24 = sphi %s1092_s24, %s1334_s24   ;;  %s1037_s23 = sphi %s1090_s23, %s1333_s23   ;;  %s1033_s22 = sphi %s1088_s22, %s1332_s22   ;;  %s1029_s21 = sphi %s1086_s21, %s1331_s21  }
   0x9   : > { %p95_p0 = scmp.ne.s32.totalorder %s1033_s22, %s1029_s21  ;;  %p1311_p1 = scmp.eq.s32.totalorder %s1107_s25, 0 }
   0xa   : > { %p188_p3 = scmp.eq.s32.totalorder %s769_s26, 1  ;;  %p770_p5 = scmp.ge.s32.totalorder %s1041_s24, 1 }
   0xb   : > { %p1116_p4 = por %p1311_p1, %p95_p0  ;;  %p195_p7 = scmp.lt.s32.totalorder %s1041_s24, 3 }
   0xc   : > { %p1121_p6 = por %p188_p3, %p95_p0  ;;  %s1043_s30 = smov [#allocation5]  }
   0xd   : > { %s1316_s27 = scalar_select %p1116_p4, 1, 0 }
   0xe   : > { %s1317_s28 = scalar_select %p1121_p6, 1, 0 }
   0xf   : > { %p1126_p8 = pnand %p770_p5, %p195_p7  ;;  %s210_s7 = sshll.u32 %s1043_s30, 4  ;;  %s211_s7 = int_to_ptr.vmem [resolvable:$true] %s210_s7 }
  0x10   : > { %s1140_s9 = sadd.s32 1, %s1041_s24   ;;  %s82_s10 = sadd.s32 1, %s1037_s23 }
  0x11   : > { %s1318_s29 = scalar_select %p1126_p8, 1, 0 }
  0x12   : > { %p853_p9 = pneg %p1126_p8  ;;  %s79_s11 = ssub.s32 %s1041_s24, %s1140_s9 }
  0x13   : > { %s930_s12 = scalar_lea.vmem %s211_s7, 768  ;;  %p938_p5 = scmp.lt.s32.totalorder %s211_s7, %s211_s7 }
  0x14   : > { %p1135_p11 = pnand %p853_p9, %p1311_p1  ;;  %p931_p13 = scmp.ne.s32.totalorder %s211_s7, %s930_s12 }
  0x15   : > { %p939_p7 = scmp.lt.s32.totalorder %s930_s12, %s930_s12 }
  0x16   : > { %p921_p12 = pneg %p1135_p11 }
  0x17   : > { %p940_p10 = por %p939_p7, %p938_p5 }
  0x18   : > { %p933_p0 = pnand %p931_p13, %p921_p12 }
  0x1a   : > { %p934_p3 = pneg %p933_p0 }
  0x1c   : > { %p941_p2 = pnand %p940_p10, %p934_p3 }
  0x1e   : > { %944 = shalt.err (!%p941_p2)
}
  0x1f   : > { %s1044_s13 = smov 64   ;;  %s1045_s14 = smov 4  }
  0x20   : > { %s1320_s4 = sld [smem:[#allocation11_spill]]  ;;  %p80_p9 = scmp.eq.s32.totalorder %s79_s11, 0 }
  0x21   : > { %p89_p12 = scmp.ne.s32.totalorder %s1037_s23, %s1033_s22  ;;  %p90_p10 = scmp.eq.s32.totalorder %s1041_s24, 0 }
  0x22   : > { %p866_p2 = scmp.lt.s32.totalorder %s1041_s24, 2  ;;  %p1321_p0 = scmp.eq.s32.totalorder %s1107_s25, 1 }
  0x23   : > { %s1157_s17 = scalar_select %p80_p9, %s1037_s23, %s82_s10  }
  0x24   : > { %p91_p13 = por %p90_p10, %p89_p12  ;;  %p1161_p3 = por %p1321_p0, %p89_p12 }
  0x25   : > { %s241_s19 = sand.u32 1, %s1037_s23   ;;  %s773_s20 = sshll.u32 %s1041_s24, 4 }
  0x26   : > { %856 = dma.hbm_to_vmem [thread:$0]  (!%p1135_p11), %s1320_s4, 768, %s211_s7, [#allocation6], %s1044_s13, %s1044_s13, %s1045_s14  }
  0x27   : > { %s1322_s18 = scalar_select %p1161_p3, 1, 0 }
  0x28   : > { %s1170_s8 = scalar_lea.hbm %s1306_s2, %s773_s20  ;;  %s244_s7 = scalar_lea.vmem [#allocation2], %s241_s19 }
  0x29   : > { %s251_s11 = sshll.u32 %s244_s7, 4  ;;  %p1172_p11 = pnand %p866_p2, %p91_p13  ;;  %s252_s11 = int_to_ptr.vmem [resolvable:$true] %s251_s11 }
  0x2a   : > { %s242_s12 = scalar_lea.sflag [#allocation3], %s241_s19  ;;  %s945_s13 = scalar_lea.hbm %s1170_s8, 16 }
  0x2b   : > { %p946_p5 = scmp.ne.s32.totalorder %s1170_s8, %s945_s13  ;;  %p947_p7 = pneg %p1172_p11 }
  0x2c   : > { %s950_s16 = scalar_lea.hbm %s1306_s2, 32  ;;  %p951_p10 = scmp.lt.s32.totalorder %s1170_s8, %s1306_s2 }
  0x2d   : > { %p948_p9 = pnand %p947_p7, %p946_p5  ;;  %p952_p2 = scmp.lt.s32.totalorder %s950_s16, %s945_s13 }
  0x2f   : > { %p949_p12 = pneg %p948_p9  ;;  %p953_p13 = por %p952_p2, %p951_p10 }
  0x31   : > { %p954_p0 = pnand %p953_p13, %p949_p12 }
  0x33   : > { %957 = shalt.err (!%p954_p0)
}
  0x34   : > { %s958_s30 = scalar_lea.vmem %s252_s11, 16  ;;  %s1046_s19 = smov [#allocation2]  }
  0x35   : > { %p959_p1 = scmp.ne.s32.totalorder %s252_s11, %s958_s30  ;;  %s963_s7 = sshll.u32 %s1046_s19, 4  ;;  %s964_s7 = int_to_ptr.vmem [resolvable:$false] %s963_s7 }
  0x36   : > { %s965_s4 = scalar_lea.vmem %s964_s7, 32  ;;  %p966_p5 = scmp.lt.s32.totalorder %s252_s11, %s964_s7 }
  0x37   : > { %p961_p6 = pnand %p959_p1, %p947_p7  ;;  %p967_p9 = scmp.lt.s32.totalorder %s965_s4, %s958_s30 }
  0x39   : > { %p962_p3 = pneg %p961_p6  ;;  %p968_p4 = por %p967_p9, %p966_p5 }
  0x3b   : > { %p969_p8 = pnand %p968_p4, %p962_p3 }
  0x3d   : > { %972 = shalt.err (!%p969_p8)
}
  0x3e   : > { %860 = dma.hbm_to_vmem [thread:$0]  (!%p1172_p11), %s1170_s8, 16, %s252_s11, %s242_s12  }
  0x3f   : > { %p1324_p12 = scmp.ne.s32.totalorder %s1318_s29, 0 }
  0x40   : > { %s1193_s13 = sand.u32 (!%p1324_p12), 1, %s1033_s22   ;;  %p1325_p1 = scmp.ne.s32.totalorder (!%p1324_p12), %s1316_s27, 0 }
  0x41   : > { %260 = sbr.rel (%p1324_p12) target bundleno = 1020 (0x3fc), region = 44  ;;  %s263_s14 = scalar_lea.sflag (!%p1324_p12), [#allocation3], %s1193_s13 }
  0x42   : > { %s265_s15 = scalar_lea.vmem (!%p1324_p12), [#allocation2], %s1193_s13 }
  0x46   : > { %1016 = dma.done.wait (%p1325_p1), %s263_s14, 16  }
  0x47   : > { %1018 = vsyncadd (%p1325_p1), %s263_s14, 4294967280  ;;  %p1326_p4 = scmp.eq.s32.totalorder %s1107_s25, 0 }
  0x49   : > { %1020 = dma.done.wait (%p1326_p4), [#allocation6], 768   ;;  %p1327_p6 = pmov %p1326_p4 }
  0x4a   : > { %p305_p8 = scmp.lt.s32.totalorder %s1107_s25, 1  ;;  %v319_v0 = vlaneseq  ;;  %v1047_v1 = vmov 0.0   ;;  %vm1048_vm0 = vmmov 0   ;;  %v1049_v3 = vmov 0   ;;  %v317_v8 = vld [vmem:[%s1307_s3] sm:$0x7] }
  0x4b   : > { %1022 = vsyncadd (%p1327_p6), [#allocation6], 4294966528  ;;  %809 = vmatprep.subr.bf16.mxu0 %v1047_v1  ;;  %811 = vmatprep.mubr.msk.bf16.mxu0 %vm1048_vm0, %v1047_v1  ;;  %vm335_vm1 = vcmask 261120   ;;  %v780_v25 = vld [vmem:[%s265_s15] ss:$0 sm:$0xff]  ;;  %vm398_vm2 = vcmask 64512  }
  0x4c   : > { %s1210_s4 = scalar_select %p305_p8, %s1107_s25, 1  ;;  %v320_v2 = vshrl.u32 %v319_v0, 7  ;;  %907 = vset.pattern.permute.xlu0 %v1049_v3  ;;  %815 = vmatprep.subr.bf16.mxu1 %v1047_v1  ;;  %vm414_vm3 = vcmask 1043456   ;;  %v910_v37 = vld [vmem:[#allocation5 + $0x8] sm:$0xff]   ;;  %v909_v41 = vld [vmem:[#allocation5 + $0x18] sm:$0xff]   ;;  %v911_v43 = vld [vmem:[#allocation5 + $0x10] sm:$0xff]  }
  0x4d   : > { %817 = vmatprep.mubr.msk.bf16.mxu1 %vm1048_vm0, %v1047_v1  ;;  %908 = vset.pattern.permute.xlu1 %v1049_v3  ;;  %v912_v44 = vld [vmem:[#allocation5] sm:$0xff]   ;;  %v913_v47 = vld [vmem:[#allocation5 + $0x28] sm:$0xff]   ;;  %s776_s30 = sshll.u32 %s1193_s13, 3  ;;  %s793_s14 = sshll.u32 %s1107_s25, 7 }
  0x4e   : > { %s777_s27 = sshll.u32 %s1210_s4, 3  ;;  %v321_v4 = vsub.s32 2, %v320_v2  ;;  %v326_v5 = vsub.s32 1, %v320_v2  ;;  %v332_v6 = vsub.s32 0, %v320_v2  ;;  %v914_v51 = vld [vmem:[#allocation5 + $0x20] sm:$0xff]   ;;  %s304_s15 = scalar_lea.vmem [#allocation7], %s776_s30 }
  0x4f   : > { %s308_s11 = scalar_lea.vmem %s1304_s0, %s777_s27  ;;  %s312_s26 = scalar_lea.vmem %s1305_s1, %s777_s27 }
  0x50   : > { %v1221_v7 = vld [vmem:[%s308_s11] sm:$0xff]  ;;  %v322_v10 = vrot.slane %v317_v8, %v321_v4  ;;  %v327_v11 = vrot.slane %v317_v8, %v326_v5  ;;  %v333_v12 = vrot.slane %v317_v8, %v332_v6  ;;  %s668_s4 = sshll.u32 %s304_s15, 4  ;;  %s1266_s8 = scalar_lea.hbm %s1310_s6, %s793_s14  ;;  %s669_s4 = int_to_ptr.vmem [resolvable:$true] %s668_s4 }
  0x51   : > { %v318_v9 = vpack.c.bf16 %v1221_v7, %v1221_v7  ;;  %v315_v19 = vld [vmem:[%s312_s26] sm:$0xff]  ;;  %s655_s11 = scalar_lea.sflag [#allocation4], %s1193_s13  ;;  %s973_s10 = scalar_lea.vmem %s669_s4, 128 }
  0x52   : > { %v323_v14 = vmul.f32 %v322_v10, %v1221_v7  ;;  %v334_v15 = vmul.f32 %v333_v12, %v1221_v7  ;;  %vm646_vm4 = vcmp.lt.f32.partialorder %v315_v19, 0.0  ;;  %p974_p3 = scmp.ne.s32.totalorder %s669_s4, %s973_s10  ;;  %p1328_p11 = scmp.ne.s32.totalorder %s1322_s18, 0 }
  0x53   : > { %v343_v13 = vsel %vm335_vm1, %v318_v9, 0  ;;  %v415_v36 = vsel %vm414_vm3, %v318_v9, 0  ;;  %v647_v45 = vsel %vm646_vm4, 1, %v1049_v3  ;;  %s1050_s25 = smov [#allocation7]  }
  0x54   : > { %810 = vmatpush3.bf16.xpose.msra.mxu0 %v343_v13  ;;  %v328_v16 = vadd.f32 %v327_v11, %v323_v14  ;;  %v336_v17 = vsel %vm335_vm1, %v334_v15, 0.0  ;;  %816 = vmatpush3.bf16.msra.mxu1 %v415_v36  ;;  %p975_p7 = pnand %p974_p3, %p1328_p11  ;;  %s977_s12 = sshll.u32 %s1050_s25, 4  ;;  %s978_s12 = int_to_ptr.vmem [resolvable:$false] %s977_s12 }
  0x55   : > { %829 = vmatprep.subr.bf16.mxu0 %v1047_v1  ;;  %337 = vadd.xlane.f32.xlu0 %v336_v17  ;;  %s979_s16 = scalar_lea.vmem %s978_s12, 256  ;;  %p980_p2 = scmp.lt.s32.totalorder %s669_s4, %s978_s12 }
  0x56   : > { %v329_v18 = vpack.c.bf16 %v328_v16, %v328_v16  ;;  %821 = vmatprep.subr.bf16.mxu1 %v1047_v1  ;;  %p976_p10 = pneg %p975_p7  ;;  %p981_p13 = scmp.lt.s32.totalorder %s979_s16, %s973_s10 }
  0x58   : > { %p982_p0 = por %p981_p13, %p980_p2 }
  0x5a   : > { %p983_p5 = pnand %p982_p0, %p976_p10 }
  0x5b   : > { %812 = vmatmul.mubr.msk.bf16.vlgmr.msra.gmra.mxu0 %vm335_vm1, %v329_v18 }
  0x5c   : > { %833 = vmatprep.mubr.msk.bf16.mxu0 %vm1048_vm0, %v1047_v1  ;;  %830 = vmatpush3.bf16.msra.mxu0 %v910_v37 }
  0x5d   : > { %831 = vmatprep.subr.bf16.mxu0 %v1047_v1 }
  0x60   : > { %832 = vmatpush3.bf16.msra.mxu0 %v912_v44 }
  0x63   : > { %834 = vmatmul.mubr.msk.bf16.vlgmr.msra.gmra.mxu0 %vm335_vm1, %v318_v9 }
  0x6b   : > { %387 = vperm.xlu0 %907, %v315_v19  }
  0xde   : > { %v338_v20 = vpop.xlane.xlu0 %337 }
  0xe6   : > { %v388_v22 = vpop.permute.xlu0 %387 }
 0x11b   : > { %v379_v21 = vpop.f32.mrf.mxu0 }
 0x11c   : > { %v380_v23 = vadd.f32 %v379_v21, %v338_v20 }
 0x11d   : > { %v813_v24 = vpop.f32.mrf.mxu0 }
 0x11e   : > { %v390_v26 = vadd.f32 %v388_v22, %v380_v23 }
 0x11f   : > { %v382_v27 = vpop.f32.mrf.mxu0 }
 0x120   : > { %v397_v28 = vadd.f32 %v780_v25, %v390_v26 }
 0x121   : > { %v814_v29 = vpop.f32.mrf.mxu0 }
 0x122   : > { %v399_v30 = vsel %vm398_vm2, %v397_v28, -inf }
 0x123   : > { %400 = vmax.xlane.f32.xlu1 %v399_v30  ;;  %v568_v55 = vpop.f32.mrf.mxu0 }
 0x125   : > { %v835_v56 = vpop.f32.mrf.mxu0 }
 0x127   : > { %v571_v57 = vpop.f32.mrf.mxu0 }
 0x129   : > { %v836_v58 = vpop.f32.mrf.mxu0 }
 0x1ac   : > { %v401_v31 = vpop.xlane.xlu1 %400 }
 0x1ad   : > { %v402_v32 = vsub.f32 %v397_v28, %v401_v31 }
 0x1af   : > { %v403_v33 = vmul.f32 1.442695, %v402_v32 }
 0x1b1   : > { %915 = vpow2.f32 %v403_v33 }
 0x1be   : > { %v916_v34 = vpop.eup %915 }
 0x1bf   : > { %v405_v35 = vsel %vm398_vm2, %v916_v34, 0.0 }
 0x1c0   : > { %406 = vadd.xlane.f32.xlu1 %v405_v35 }
 0x1d1   : > { %649 = vperm.xlu1 %908, %v647_v45  }
 0x249   : > { %v407_v38 = vpop.xlane.xlu1 %406 }
 0x24a   : > { %917 = vrcp.f32 %v407_v38 }
 0x24d   : > { %v650_v3 = vpop.permute.xlu1 %649 }
 0x24e   : > { %vm651_vm5 = vcmp.eq.s32.totalorder %v650_v3, 1 }
 0x257   : > { %v918_v39 = vpop.eup %917 }
 0x258   : > { %v409_v40 = vmul.f32 %v918_v39, %v916_v34 }
 0x25a   : > { %v410_v42 = vpack.c.bf16 %v409_v40, %v409_v40 }
 0x25c   : > { %818 = vmatmul.mubr.msk.bf16.vlgmr.msra.gmra.mxu1 %vm398_vm2, %v410_v42 }
 0x25d   : > { %822 = vmatpush3.bf16.msra.mxu1 %v909_v41  ;;  %825 = vmatprep.mubr.msk.bf16.mxu1 %vm1048_vm0, %v1047_v1 }
 0x25e   : > { %823 = vmatprep.subr.bf16.mxu1 %v1047_v1 }
 0x261   : > { %824 = vmatpush3.bf16.msra.mxu1 %v911_v43 }
 0x262   : > { %837 = vmatprep.subr.bf16.mxu1 %v1047_v1 }
 0x31c   : > { %v451_v46 = vpop.f32.mrf.mxu1 }
 0x31d   : > { %v461_v48 = vpack.c.bf16 %v451_v46, %v451_v46  ;;  %v574_v52 = vmul.f32 %v451_v46, %v1221_v7 }
 0x31e   : > { %v819_v49 = vpop.f32.mrf.mxu1 }
 0x31f   : > { %826 = vmatmul.mubr.msk.bf16.vlgmr.msra.gmra.mxu1 %vm335_vm1, %v461_v48  ;;  %v575_v54 = vpack.c.bf16 %v574_v52, %v574_v52 }
 0x320   : > { %838 = vmatpush3.bf16.msra.mxu1 %v913_v47  ;;  %v454_v50 = vpop.f32.mrf.mxu1  ;;  %841 = vmatprep.mubr.msk.bf16.mxu1 %vm1048_vm0, %v1047_v1 }
 0x321   : > { %839 = vmatprep.subr.bf16.mxu1 %v1047_v1  ;;  %v791_v1 = vld [vmem:[%s1309_s5] ss:$0 sm:$0xff] }
 0x322   : > { %v820_v53 = vpop.f32.mrf.mxu1 }
 0x324   : > { %840 = vmatpush3.bf16.msra.mxu1 %v914_v51 }
 0x327   : > { %842 = vmatmul.mubr.msk.bf16.vlgmr.msra.gmra.mxu1 %vm335_vm1, %v575_v54 }
 0x3df   : > { %v516_v59 = vpop.f32.mrf.mxu1 }
 0x3e0   : > { %v569_v63 = vadd.f32 %v568_v55, %v516_v59 }
 0x3e1   : > { %v827_v60 = vpop.f32.mrf.mxu1 }
 0x3e3   : > { %v519_v61 = vpop.f32.mrf.mxu1 }
 0x3e5   : > { %v828_v62 = vpop.f32.mrf.mxu1 }
 0x3e7   : > { %v630_v0 = vpop.f32.mrf.mxu1 }
 0x3e8   : > { %v636_v2 = vadd.f32 %v630_v0, %v569_v63 }
 0x3e9   : > { %v843_v4 = vpop.f32.mrf.mxu1 }
 0x3ea   : > { %v644_v5 = vadd.f32 %v791_v1, %v636_v2 }
 0x3eb   : > { %v633_v6 = vpop.f32.mrf.mxu1 }
 0x3ec   : > { %v645_v7 = vmax.f32 %v644_v5, 0.0 }
 0x3ed   : > { %v844_v8 = vpop.f32.mrf.mxu1 }
 0x3ee   : > { %v652_v9 = vsel %vm651_vm5, 0.0, %v645_v7 }
 0x3ef   : > { %653 = vst.msk [vmem:[%s304_s15] sm:$0xff] %vm335_vm1, %v652_v9 }
 0x3f0   : > { %986 = shalt.err (!%p983_p5)
}
 0x3f1   : > { %s987_s20 = scalar_lea.hbm %s1266_s8, 128  ;;  %s991_s30 = scalar_lea.hbm %s1310_s6, 256 }
 0x3f2   : > { %p988_p9 = scmp.ne.s32.totalorder %s1266_s8, %s987_s20  ;;  %p992_p4 = scmp.lt.s32.totalorder %s1266_s8, %s1310_s6 }
 0x3f3   : > { %p993_p6 = scmp.lt.s32.totalorder %s991_s30, %s987_s20 }
 0x3f4   : > { %p989_p12 = pnand %p988_p9, %p1328_p11 }
 0x3f5   : > { %p994_p8 = por %p993_p6, %p992_p4 }
 0x3f6   : > { %p990_p1 = pneg %p989_p12 }
 0x3f8   : > { %p995_p3 = pnand %p994_p8, %p990_p1 }
 0x3fa   : > { %998 = shalt.err (!%p995_p3)
}
 0x3fb   : > { %851 = dma.vmem_to_hbm [thread:$0]  (%p1328_p11), %s669_s4, 128, %s1266_s8, %s655_s11  }
 0x3fc PF: > { %s680_s14 = sand.u32 1, %s1029_s21   ;;  %p1329_p7 = scmp.ne.s32.totalorder %s1317_s28, 0 }
 0x3fd   : > { %p1330_p10 = scmp.ge.s32.totalorder %s1041_s24, 2  ;;  %s681_s15 = scalar_lea.sflag [#allocation4], %s680_s14 }
 0x3ff   : > { %p862_p2 = pnand %p1330_p10, %p1329_p7 }
 0x401   : > { %p863_p13 = pneg %p862_p2 }
 0x403   : > { %1024 = dma.done.wait (%p863_p13), %s681_s15, 128  }
 0x404   : > { %1026 = vsyncadd (%p863_p13), %s681_s15, 4294967168  ;;  %p20_p0 = scmp.ge.s32.totalorder %s1140_s9, 4   ;;  %s1331_s21 = smov %s1033_s22 }
 0x405   : > { %s1332_s22 = smov %s1037_s23  ;;  %s1333_s23 = smov %s1157_s17 }
 0x406   : > { %s1334_s24 = smov %s1140_s9  ;;  %22 = sbr.rel (!%p20_p0) target bundleno = 8 (0x8), region = 101 }
 0x40b   :  { %686 = vsyncpa [#allocation3], 1 }
 0x40c   :  { %688 = vsyncpa [#allocation3 + $0x1], 1 }
 0x40d   :  { %689 = vsyncpa [#allocation6], 1 }
 0x40e   :  { %690 = vsyncpa [#allocation4], 1 }
 0x40f   :  { %692 = vsyncpa [#allocation4 + $0x1], 1 }

</bundles_post_ra>
